<compile_context>
chip_gen: v6e
topology: v6e:2x2x1
jax: 0.10.0
libtpu: 0.0.40
codegen_flags: <defaults>
</compile_context>

<pallas_src>
import functools

import jax
import jax.numpy as jnp
from jax.experimental import pallas as pl
from jax.experimental.pallas import tpu as pltpu


def _round_up(x: int, m: int) -> int:
    return ((x + m - 1) // m) * m


def _tensorcores_per_chip() -> int:
    """Best-effort detection: v7x has 2 TensorCores/chip, v5e/v6e have 1."""
    try:
        kind = jax.devices()[0].device_kind.lower()
    except Exception:
        return 1
    return 2 if ("v7" in kind or "7x" in kind) else 1


def prepare_linear_params(w_kn, b):
    """One-time parameter prep (module init / closure constant).

    Pads the output dim to a lane-aligned width (multiple of 128), casts the
    weight to bf16 and the bias to f32 once, so the per-call forward path is
    free of pad/cast XLA ops.
    """
    K, N = w_kn.shape
    Np = _round_up(N, 128)
    w_p = w_kn if Np == N else jnp.pad(w_kn, ((0, 0), (0, Np - N)))
    b_p = b if Np == N else jnp.pad(b, (0, Np - N))
    w_bf = w_p.astype(jnp.bfloat16)                 # (K, Np) bf16, stored once
    b_f32 = b_p.reshape(1, Np).astype(jnp.float32)  # (1, Np) f32, stored once
    return w_bf, b_f32, N


def linear_kernel(x_ref, w_ref, b_ref, o_ref):
    # x_ref: (tm, K) bf16   w_ref: (K, tn) bf16   b_ref: (1, tn) f32
    # o_ref: (tm, tn) f32  (lane-dense: tn is a multiple of 128)
    acc = jnp.dot(x_ref[...], w_ref[...], preferred_element_type=jnp.float32)
    o_ref[...] = (acc + b_ref[...]).astype(o_ref.dtype)


@functools.partial(jax.jit, static_argnames=("n_out", "tm", "tn"))
def _linear_forward_padded(x, w_bf, b_f32, *, n_out, tm, tn):
    M, K = x.shape
    K2, Np = w_bf.shape
    assert K == K2, (K, K2)
    assert Np % tn == 0 and tn % 128 == 0

    Mp = _round_up(M, tm)
    x_p = x if Mp == M else jnp.pad(x, ((0, Mp - M), (0, 0)))
    x_bf = x_p.astype(jnp.bfloat16)  # x is a few KB; this cast is noise

    grid = (Mp // tm, Np // tn)

    # VMEM working-set estimate: double-buffered inputs + output tile.
    # Guard before the probe is scaled (e.g. large input_dim) to avoid a
    # silent scoped-VMEM cliff; at the current size this is ~1 MB.
    vmem_bytes = 2 * (tm * K * 2 + K * tn * 2 + tn * 4 + tm * tn * 4)
    assert vmem_bytes < 48 * 1024 * 1024, (
        "Tile working set too large for VMEM; shrink tn or tile K.")

    cost = pl.CostEstimate(
        flops=2 * Mp * K * Np,
        transcendentals=0,
        bytes_accessed=K * Np * 2 + Mp * K * 2 + Mp * Np * 4 + Np * 4,
    )

    out_padded = pl.pallas_call(
        linear_kernel,
        out_shape=jax.ShapeDtypeStruct((Mp, Np), jnp.float32),
        grid_spec=pltpu.PrefetchScalarGridSpec(
            num_scalar_prefetch=0,
            grid=grid,
            in_specs=[
                pl.BlockSpec((tm, K), lambda i, j: (i, 0)),   # x row tile (full K)
                pl.BlockSpec((K, tn), lambda i, j: (0, j)),   # weight column block
                pl.BlockSpec((1, tn), lambda i, j: (0, j)),   # bias column block
            ],
            out_specs=pl.BlockSpec((tm, tn), lambda i, j: (i, j)),
        ),
        compiler_params=pltpu.CompilerParams(
            # On single-TC v5e/v6e the grid is (1, 1) so this is a no-op; on
            # v7x the 2-way N split is sharded across both TensorCores.
            dimension_semantics=("parallel", "parallel"),
            vmem_limit_bytes=max(32 * 1024 * 1024, int(vmem_bytes)),
        ),
        cost_estimate=cost,
    )(x_bf, w_bf, b_f32)

    # Drop padding (M and N).
    return out_padded[:M, :n_out]


def linear_forward(x, w_bf, b_f32, n_out):
    """y = x @ W + b with pre-prepared params. x:(M,K) f32 -> (M, n_out) f32."""
    M, K = x.shape
    _, Np = w_bf.shape

    # bf16 packs 16 sublanes per vreg: align tm to 16 when batch allows.
    sub = 8 if M <= 8 else 16
    tm = min(256, _round_up(M, sub))

    # N tiling: single block (grid (1,1)) on single-TC chips; 2-way split on
    # v7x so each TensorCore streams half the (K, Np) bf16 weight.
    if _tensorcores_per_chip() >= 2 and Np >= 256 and (Np // 2) % 128 == 0:
        tn = Np // 2
    else:
        tn = Np

    return _linear_forward_padded(x, w_bf, b_f32, n_out=n_out, tm=tm, tn=tn)


if __name__ == "__main__":
    # Shapes consistent with the module: x [batch, input_dim], output_dim = 1000.
    batch = 8
    input_dim = 256
    output_dim = 1000

    key = jax.random.PRNGKey(0)
    kx, kw, kb = jax.random.split(key, 3)

    # Deterministic init mimicking nn.Linear's uniform(-1/sqrt(in), 1/sqrt(in)).
    # Weight is created directly in (input_dim, output_dim) = nn.Linear weight.T
    # layout, so no transpose is needed at call time.
    bound = 1.0 / (input_dim ** 0.5)
    w_kn = jax.random.uniform(kw, (input_dim, output_dim), jnp.float32, -bound, bound)
    bias = jax.random.uniform(kb, (output_dim,), jnp.float32, -bound, bound)
    x = jax.random.normal(kx, (batch, input_dim), jnp.float32)

    # One-time "module init": pre-pad + pre-cast the parameters.
    w_bf, b_f32, n_out = prepare_linear_params(w_kn, bias)

    y = linear_forward(x, w_bf, b_f32, n_out)
    y = jax.block_until_ready(y)
    assert y.shape == (batch, output_dim), y.shape
    assert y.dtype == jnp.float32, y.dtype

    # Reference with the same bf16 operand quantization (f32 accumulate),
    # matching the kernel's documented numerics choice.
    x_q = x.astype(jnp.bfloat16).astype(jnp.float32)
    w_q = w_kn.astype(jnp.bfloat16).astype(jnp.float32)
    y_ref = x_q @ w_q + bias[None, :]
    assert jnp.allclose(y, y_ref, atol=2e-3, rtol=1e-3), float(
        jnp.max(jnp.abs(y - y_ref))
    )

    print("KERNEL_OK")
</pallas_src>

<mosaic_0001>
module attributes {stable_mosaic.version = 11 : i64} {
  func.func @linear_kernel(%arg0: i32, %arg1: i32, %arg2: memref<8x256xbf16, #tpu.memory_space<vmem>>, %arg3: memref<256x1024xbf16, #tpu.memory_space<vmem>>, %arg4: memref<1x1024xf32, #tpu.memory_space<vmem>>, %arg5: memref<8x1024xf32, #tpu.memory_space<vmem>>) attributes {dimension_semantics = [#tpu.dimension_semantics<parallel>, #tpu.dimension_semantics<parallel>], iteration_bounds = array<i64: 1, 1>, scalar_prefetch = 0 : i64, scratch_operands = 0 : i64, tpu.core_type = #tpu.core_type<tc>, window_params = [{transform_indices = @transform_0, window_bounds = array<i64: 8, 256>}, {transform_indices = @transform_1, window_bounds = array<i64: 256, 1024>}, {transform_indices = @transform_2, window_bounds = array<i64: 1, 1024>}, {transform_indices = @transform_3, window_bounds = array<i64: 8, 1024>}]} {
    %c0 = arith.constant 0 : index
    %c0_0 = arith.constant 0 : index
    %0 = vector.load %arg2[%c0, %c0_0] : memref<8x256xbf16, #tpu.memory_space<vmem>>, vector<8x256xbf16>
    %c0_1 = arith.constant 0 : index
    %c0_2 = arith.constant 0 : index
    %1 = vector.load %arg3[%c0_1, %c0_2] : memref<256x1024xbf16, #tpu.memory_space<vmem>>, vector<256x1024xbf16>
    %cst = arith.constant dense<0.000000e+00> : vector<8x1024xf32>
    %2 = tpu.matmul %0, %1, %cst {dimension_numbers = #tpu.dot_dimension_numbers<[1], [0], [0], [1], [0, 0, 1, 1], [], []>} : vector<8x256xbf16>, vector<256x1024xbf16>, vector<8x1024xf32> -> vector<8x1024xf32>
    %c0_3 = arith.constant 0 : index
    %c0_4 = arith.constant 0 : index
    %3 = vector.load %arg4[%c0_3, %c0_4] : memref<1x1024xf32, #tpu.memory_space<vmem>>, vector<1x1024xf32>
    %4 = vector.broadcast %3 : vector<1x1024xf32> to vector<8x1024xf32>
    %5 = arith.addf %2, %4 : vector<8x1024xf32>
    %c0_5 = arith.constant 0 : index
    %c0_6 = arith.constant 0 : index
    %6 = vector.load %arg5[%c0_5, %c0_6] : memref<8x1024xf32, #tpu.memory_space<vmem>>, vector<8x1024xf32>
    tpu.vector_store %arg5[%c0_5, %c0_6], %5 {strides = array<i32>} : memref<8x1024xf32, #tpu.memory_space<vmem>>, vector<8x1024xf32>,
    return
  }
  func.func @transform_0(%arg0: i32, %arg1: i32) -> (i32, i32) {
    %c0_i32 = arith.constant 0 : i32
    %c0_i32_0 = arith.constant 0 : i32
    return %arg0, %c0_i32 : i32, i32
  }
  func.func @transform_1(%arg0: i32, %arg1: i32) -> (i32, i32) {
    %c0_i32 = arith.constant 0 : i32
    %c0_i32_0 = arith.constant 0 : i32
    return %c0_i32, %arg1 : i32, i32
  }
  func.func @transform_2(%arg0: i32, %arg1: i32) -> (i32, i32) {
    %c0_i32 = arith.constant 0 : i32
    %c0_i32_0 = arith.constant 0 : i32
    return %c0_i32, %arg1 : i32, i32
  }
  func.func @transform_3(%arg0: i32, %arg1: i32) -> (i32, i32) {
    %c0_i32 = arith.constant 0 : i32
    return %arg0, %arg1 : i32, i32
  }
}

</mosaic_0001>

<bundles_post_ra>
// kernel: _linear_forward_padded.1
= control target key start
LH: loop header
LB: loop body
LE: loop exit
PB: predicated region body
PF: predicated region fallthrough
CT: control target
= control target key end

     0   :  { %8 = vsyncpa [#allocation3], 0  ;;  %s1268_s0 = inlined_call_operand.vmem [shape: bf16[8,256], index: 0, kind: input, shape index: {}]   ;;  %s1269_s1 = inlined_call_operand.hbm [shape: bf16[256,1024], index: 1, kind: input, shape index: {}]   ;;  %s1270_s2 = inlined_call_operand.vmem [shape: f32[1,1024], index: 2, kind: input, shape index: {}]   ;;  %s1271_s3 = inlined_call_operand.hbm [shape: f32[8,1024], index: 3, kind: output, shape index: {}]  }
   0x1   :  { %9 = vsyncpa [#allocation4], 0  ;;  %s1214_s12 = smov [#allocation2]  }
   0x2   :  { %s17_s13 = sshll.u32 %s1214_s12, 4  ;;  %s18_s13 = int_to_ptr.vmem [resolvable:$true] %s17_s13 }
   0x3   :  { %s1178_s14 = scalar_lea.vmem %s18_s13, 16384  ;;  %p1183_p1 = scmp.lt.s32.totalorder %s18_s13, %s18_s13 }
   0x4   :  { %p1179_p0 = scmp.ne.s32.totalorder %s18_s13, %s1178_s14  ;;  %p1184_p2 = scmp.lt.s32.totalorder %s1178_s14, %s1178_s14 }
   0x6   :  { %p1185_p3 = por %p1184_p2, %p1183_p1 }
   0x8   :  { %p1186_p4 = pnand %p1185_p3, %p1179_p0 }
   0xa   :  { %1189 = shalt.err (!%p1186_p4)
}
   0xb   :  { %s1215_s15 = smov 512   ;;  %s1216_s16 = smov 32  }
   0xc   :  { %23 = dma.hbm_to_vmem [thread:$0]  %s1269_s1, 16384, %s18_s13, [#allocation3], %s1215_s15, %s1215_s15, %s1216_s16  }
   0xd   :  { %1210 = dma.done.wait [#allocation3], 16384  }
   0xe   :  { %1211 = vsyncadd [#allocation3], 4294950912  ;;  %v86_v0 = vld [vmem:[#allocation2 + $0x1c0] sm:$0xff]  ;;  %v87_v2 = vld [vmem:[#allocation2 + $0x1c8] sm:$0xff] }
   0xf   :  { %v90_v1 = vld [vmem:[#allocation2 + $0x1e0] sm:$0xff]  ;;  %v91_v4 = vld [vmem:[#allocation2 + $0x1e8] sm:$0xff] }
  0x10   :  { %v1093_v3 = vcombine.high %v86_v0, %v90_v1  ;;  %v1092_v5 = vcombine.low %v86_v0, %v90_v1  ;;  %v78_v6 = vld [vmem:[#allocation2 + $0x180] sm:$0xff]  ;;  %v1095_v8 = vcombine.high %v87_v2, %v91_v4  ;;  %v1094_v9 = vcombine.low %v87_v2, %v91_v4  ;;  %v79_v11 = vld [vmem:[#allocation2 + $0x188] sm:$0xff] }
  0x11   :  { %v82_v7 = vld [vmem:[#allocation2 + $0x1a0] sm:$0xff]  ;;  %v83_v12 = vld [vmem:[#allocation2 + $0x1a8] sm:$0xff] }
  0x12   :  { %v1085_v10 = vcombine.high %v78_v6, %v82_v7  ;;  %v70_v13 = vld [vmem:[#allocation2 + $0x140] sm:$0xff]  ;;  %847 = vmatprep.subr.bf16.mxu0 %v1093_v3  ;;  %v1087_v14 = vcombine.high %v79_v11, %v83_v12  ;;  %v71_v16 = vld [vmem:[#allocation2 + $0x148] sm:$0xff]  ;;  %888 = vmatprep.subr.bf16.mxu1 %v1095_v8  ;;  %v1084_v18 = vcombine.low %v78_v6, %v82_v7 }
  0x13   :  { %v74_v15 = vld [vmem:[#allocation2 + $0x160] sm:$0xff]  ;;  %v75_v17 = vld [vmem:[#allocation2 + $0x168] sm:$0xff]  ;;  %848 = vmatpush1.bf16.msra.mxu0 %v1092_v5  ;;  %889 = vmatpush1.bf16.msra.mxu1 %v1094_v9  ;;  %v1086_v19 = vcombine.low %v79_v11, %v83_v12 }
  0x14   :  { %849 = vmatprep.subr.bf16.mxu0 %v1085_v10  ;;  %v1077_v20 = vcombine.high %v70_v13, %v74_v15  ;;  %890 = vmatprep.subr.bf16.mxu1 %v1087_v14  ;;  %v1079_v21 = vcombine.high %v71_v16, %v75_v17  ;;  %v62_v22 = vld [vmem:[#allocation2 + $0x100] sm:$0xff]  ;;  %v63_v24 = vld [vmem:[#allocation2 + $0x108] sm:$0xff]  ;;  %v1076_v26 = vcombine.low %v70_v13, %v74_v15 }
  0x15   :  { %v66_v23 = vld [vmem:[#allocation2 + $0x120] sm:$0xff]  ;;  %v67_v25 = vld [vmem:[#allocation2 + $0x128] sm:$0xff]  ;;  %v1078_v27 = vcombine.low %v71_v16, %v75_v17 }
  0x16   :  { %v1069_v28 = vcombine.high %v62_v22, %v66_v23  ;;  %v1071_v29 = vcombine.high %v63_v24, %v67_v25  ;;  %v54_v30 = vld [vmem:[#allocation2 + $0xc0] sm:$0xff]  ;;  %v55_v32 = vld [vmem:[#allocation2 + $0xc8] sm:$0xff]  ;;  %v1068_v34 = vcombine.low %v62_v22, %v66_v23  ;;  %v1070_v35 = vcombine.low %v63_v24, %v67_v25 }
  0x17   :  { %850 = vmatpush1.bf16.msra.mxu0 %v1084_v18  ;;  %891 = vmatpush1.bf16.msra.mxu1 %v1086_v19  ;;  %v58_v31 = vld [vmem:[#allocation2 + $0xe0] sm:$0xff]  ;;  %v59_v33 = vld [vmem:[#allocation2 + $0xe8] sm:$0xff] }
  0x18   :  { %851 = vmatprep.subr.bf16.mxu0 %v1077_v20  ;;  %892 = vmatprep.subr.bf16.mxu1 %v1079_v21  ;;  %v1061_v36 = vcombine.high %v54_v30, %v58_v31  ;;  %v1063_v37 = vcombine.high %v55_v32, %v59_v33  ;;  %v46_v38 = vld [vmem:[#allocation2 + $0x80] sm:$0xff]  ;;  %v47_v40 = vld [vmem:[#allocation2 + $0x88] sm:$0xff]  ;;  %v1060_v42 = vcombine.low %v54_v30, %v58_v31 }
  0x19   :  { %v50_v39 = vld [vmem:[#allocation2 + $0xa0] sm:$0xff]  ;;  %v51_v41 = vld [vmem:[#allocation2 + $0xa8] sm:$0xff]  ;;  %v1062_v43 = vcombine.low %v55_v32, %v59_v33 }
  0x1a   :  { %v1053_v44 = vcombine.high %v46_v38, %v50_v39  ;;  %v1055_v45 = vcombine.high %v47_v40, %v51_v41  ;;  %v38_v46 = vld [vmem:[#allocation2 + $0x40] sm:$0xff]  ;;  %v39_v48 = vld [vmem:[#allocation2 + $0x48] sm:$0xff]  ;;  %v1052_v50 = vcombine.low %v46_v38, %v50_v39  ;;  %v1054_v51 = vcombine.low %v47_v40, %v51_v41 }
  0x1b   :  { %852 = vmatpush1.bf16.msra.mxu0 %v1076_v26  ;;  %893 = vmatpush1.bf16.msra.mxu1 %v1078_v27  ;;  %v42_v47 = vld [vmem:[#allocation2 + $0x60] sm:$0xff]  ;;  %v43_v49 = vld [vmem:[#allocation2 + $0x68] sm:$0xff] }
  0x1c   :  { %853 = vmatprep.subr.bf16.mxu0 %v1069_v28  ;;  %894 = vmatprep.subr.bf16.mxu1 %v1071_v29  ;;  %v1045_v52 = vcombine.high %v38_v46, %v42_v47  ;;  %v1244_v53 = vld [vmem:[%s1268_s0] sm:$0xff]  ;;  %v1047_v54 = vcombine.high %v39_v48, %v43_v49  ;;  %v31_v58 = vld [vmem:[#allocation2 + $0x8] sm:$0xff]  ;;  %v1044_v60 = vcombine.low %v38_v46, %v42_v47 }
  0x1d   :  { %v30_v55 = vld [vmem:[#allocation2] sm:$0xff]  ;;  %v1248_v57 = vcombine.high %v1244_v53, %v1244_v53  ;;  %v35_v59 = vld [vmem:[#allocation2 + $0x28] sm:$0xff]  ;;  %v1046_v61 = vcombine.low %v39_v48, %v43_v49 }
  0x1e   :  { %v34_v56 = vld [vmem:[#allocation2 + $0x20] sm:$0xff]  ;;  %v1039_v63 = vcombine.high %v31_v58, %v35_v59  ;;  %v151_v2 = vld [vmem:[#allocation2 + $0x3c8] sm:$0xff]  ;;  %v1038_v5 = vcombine.low %v31_v58, %v35_v59 }
  0x1f   :  { %854 = vmatpush1.bf16.msra.mxu0 %v1068_v34  ;;  %895 = vmatpush1.bf16.msra.mxu1 %v1070_v35  ;;  %v1037_v62 = vcombine.high %v30_v55, %v34_v56  ;;  %v150_v0 = vld [vmem:[#allocation2 + $0x3c0] sm:$0xff]  ;;  %v155_v3 = vld [vmem:[#allocation2 + $0x3e8] sm:$0xff]  ;;  %v1036_v4 = vcombine.low %v30_v55, %v34_v56 }
  0x20   :  { %855 = vmatprep.subr.bf16.mxu0 %v1061_v36  ;;  %896 = vmatprep.subr.bf16.mxu1 %v1063_v37  ;;  %v154_v1 = vld [vmem:[#allocation2 + $0x3e0] sm:$0xff]  ;;  %v1159_v7 = vcombine.high %v151_v2, %v155_v3  ;;  %v143_v10 = vld [vmem:[#allocation2 + $0x388] sm:$0xff]  ;;  %v1158_v13 = vcombine.low %v151_v2, %v155_v3  ;;  %v88_v2 = vld [vmem:[#allocation2 + $0x1d0] sm:$0xff] }
  0x21   :  { %879 = vmatprep.mubr.bf16.mxu0 %v1248_v57  ;;  %920 = vmatprep.mubr.bf16.mxu1 %v1248_v57  ;;  %v1157_v6 = vcombine.high %v150_v0, %v154_v1  ;;  %v142_v8 = vld [vmem:[#allocation2 + $0x380] sm:$0xff]  ;;  %v147_v11 = vld [vmem:[#allocation2 + $0x3a8] sm:$0xff]  ;;  %v1156_v12 = vcombine.low %v150_v0, %v154_v1  ;;  %v92_v3 = vld [vmem:[#allocation2 + $0x1f0] sm:$0xff] }
  0x22   :  { %v146_v9 = vld [vmem:[#allocation2 + $0x3a0] sm:$0xff]  ;;  %v1151_v15 = vcombine.high %v143_v10, %v147_v11  ;;  %v135_v18 = vld [vmem:[#allocation2 + $0x348] sm:$0xff]  ;;  %v1150_v21 = vcombine.low %v143_v10, %v147_v11  ;;  %v80_v10 = vld [vmem:[#allocation2 + $0x190] sm:$0xff] }
  0x23   :  { %856 = vmatpush1.bf16.msra.mxu0 %v1060_v42  ;;  %897 = vmatpush1.bf16.msra.mxu1 %v1062_v43  ;;  %v1149_v14 = vcombine.high %v142_v8, %v146_v9  ;;  %v134_v16 = vld [vmem:[#allocation2 + $0x340] sm:$0xff]  ;;  %v139_v19 = vld [vmem:[#allocation2 + $0x368] sm:$0xff]  ;;  %v1148_v20 = vcombine.low %v142_v8, %v146_v9  ;;  %v1097_v8 = vcombine.high %v88_v2, %v92_v3  ;;  %v84_v11 = vld [vmem:[#allocation2 + $0x1b0] sm:$0xff] }
  0x24   :  { %857 = vmatprep.subr.bf16.mxu0 %v1053_v44  ;;  %898 = vmatprep.subr.bf16.mxu1 %v1055_v45  ;;  %v138_v17 = vld [vmem:[#allocation2 + $0x360] sm:$0xff]  ;;  %v1143_v23 = vcombine.high %v135_v18, %v139_v19  ;;  %v127_v26 = vld [vmem:[#allocation2 + $0x308] sm:$0xff]  ;;  %v1142_v29 = vcombine.low %v135_v18, %v139_v19  ;;  %v72_v19 = vld [vmem:[#allocation2 + $0x150] sm:$0xff] }
  0x25   :  { %v1141_v22 = vcombine.high %v134_v16, %v138_v17  ;;  %v126_v24 = vld [vmem:[#allocation2 + $0x300] sm:$0xff]  ;;  %v131_v27 = vld [vmem:[#allocation2 + $0x328] sm:$0xff]  ;;  %v1140_v28 = vcombine.low %v134_v16, %v138_v17  ;;  %v1089_v17 = vcombine.high %v80_v10, %v84_v11 }
  0x26   :  { %v130_v25 = vld [vmem:[#allocation2 + $0x320] sm:$0xff]  ;;  %v1135_v31 = vcombine.high %v127_v26, %v131_v27  ;;  %v119_v34 = vld [vmem:[#allocation2 + $0x2c8] sm:$0xff]  ;;  %v1134_v37 = vcombine.low %v127_v26, %v131_v27  ;;  %v64_v26 = vld [vmem:[#allocation2 + $0x110] sm:$0xff] }
  0x27   :  { %858 = vmatpush1.bf16.msra.mxu0 %v1052_v50  ;;  %899 = vmatpush1.bf16.msra.mxu1 %v1054_v51  ;;  %v1133_v30 = vcombine.high %v126_v24, %v130_v25  ;;  %v118_v32 = vld [vmem:[#allocation2 + $0x2c0] sm:$0xff]  ;;  %v123_v35 = vld [vmem:[#allocation2 + $0x2e8] sm:$0xff]  ;;  %v1132_v36 = vcombine.low %v126_v24, %v130_v25  ;;  %v68_v27 = vld [vmem:[#allocation2 + $0x130] sm:$0xff] }
  0x28   :  { %859 = vmatprep.subr.bf16.mxu0 %v1045_v52  ;;  %900 = vmatprep.subr.bf16.mxu1 %v1047_v54  ;;  %v122_v33 = vld [vmem:[#allocation2 + $0x2e0] sm:$0xff]  ;;  %v1127_v39 = vcombine.high %v119_v34, %v123_v35  ;;  %v111_v42 = vld [vmem:[#allocation2 + $0x288] sm:$0xff]  ;;  %v1126_v45 = vcombine.low %v119_v34, %v123_v35  ;;  %v56_v34 = vld [vmem:[#allocation2 + $0xd0] sm:$0xff] }
  0x29   :  { %v1125_v38 = vcombine.high %v118_v32, %v122_v33  ;;  %v110_v40 = vld [vmem:[#allocation2 + $0x280] sm:$0xff]  ;;  %v115_v43 = vld [vmem:[#allocation2 + $0x2a8] sm:$0xff]  ;;  %v1124_v44 = vcombine.low %v118_v32, %v122_v33  ;;  %v1073_v32 = vcombine.high %v64_v26, %v68_v27  ;;  %v60_v35 = vld [vmem:[#allocation2 + $0xf0] sm:$0xff] }
  0x2a   :  { %v114_v41 = vld [vmem:[#allocation2 + $0x2a0] sm:$0xff]  ;;  %v1119_v47 = vcombine.high %v111_v42, %v115_v43  ;;  %v103_v50 = vld [vmem:[#allocation2 + $0x248] sm:$0xff]  ;;  %v1118_v54 = vcombine.low %v111_v42, %v115_v43  ;;  %v52_v42 = vld [vmem:[#allocation2 + $0xb0] sm:$0xff] }
  0x2b   :  { %860 = vmatpush1.bf16.msra.mxu0 %v1044_v60  ;;  %901 = vmatpush1.bf16.msra.mxu1 %v1046_v61  ;;  %v1117_v46 = vcombine.high %v110_v40, %v114_v41  ;;  %v102_v48 = vld [vmem:[#allocation2 + $0x240] sm:$0xff]  ;;  %v107_v51 = vld [vmem:[#allocation2 + $0x268] sm:$0xff]  ;;  %v1116_v52 = vcombine.low %v110_v40, %v114_v41  ;;  %v1065_v40 = vcombine.high %v56_v34, %v60_v35  ;;  %v48_v41 = vld [vmem:[#allocation2 + $0x90] sm:$0xff] }
  0x2c   :  { %861 = vmatprep.subr.bf16.mxu0 %v1037_v62  ;;  %902 = vmatprep.subr.bf16.mxu1 %v1039_v63  ;;  %v106_v49 = vld [vmem:[#allocation2 + $0x260] sm:$0xff]  ;;  %v1111_v56 = vcombine.high %v103_v50, %v107_v51  ;;  %v95_v60 = vld [vmem:[#allocation2 + $0x208] sm:$0xff]  ;;  %v1110_v63 = vcombine.low %v103_v50, %v107_v51  ;;  %v49_v43 = vld [vmem:[#allocation2 + $0x98] sm:$0xff] }
  0x2d   :  { %v1109_v55 = vcombine.high %v102_v48, %v106_v49  ;;  %v94_v58 = vld [vmem:[#allocation2 + $0x200] sm:$0xff]  ;;  %v99_v61 = vld [vmem:[#allocation2 + $0x228] sm:$0xff]  ;;  %v1108_v62 = vcombine.low %v102_v48, %v106_v49  ;;  %v40_v49 = vld [vmem:[#allocation2 + $0x50] sm:$0xff] }
  0x2e   :  { %v98_v59 = vld [vmem:[#allocation2 + $0x220] sm:$0xff]  ;;  %v1103_v1 = vcombine.high %v95_v60, %v99_v61  ;;  %v44_v50 = vld [vmem:[#allocation2 + $0x70] sm:$0xff]  ;;  %v41_v51 = vld [vmem:[#allocation2 + $0x58] sm:$0xff] }
  0x2f   :  { %862 = vmatpush1.bf16.msra.mxu0 %v1036_v4  ;;  %903 = vmatpush1.bf16.msra.mxu1 %v1038_v5  ;;  %v1101_v0 = vcombine.high %v94_v58, %v98_v59  ;;  %v89_v4 = vld [vmem:[#allocation2 + $0x1d8] sm:$0xff] }
  0x30   :  { %863 = vmatprep.subr.bf16.mxu0 %v1157_v6  ;;  %904 = vmatprep.subr.bf16.mxu1 %v1159_v7  ;;  %v93_v5 = vld [vmem:[#allocation2 + $0x1f8] sm:$0xff]  ;;  %v1100_v6 = vcombine.low %v94_v58, %v98_v59  ;;  %v1102_v7 = vcombine.low %v95_v60, %v99_v61  ;;  %v32_v59 = vld [vmem:[#allocation2 + $0x10] sm:$0xff] }
  0x31   :  { %v1099_v9 = vcombine.high %v89_v4, %v93_v5  ;;  %v1098_v16 = vcombine.low %v89_v4, %v93_v5  ;;  %v36_v60 = vld [vmem:[#allocation2 + $0x30] sm:$0xff]  ;;  %v33_v61 = vld [vmem:[#allocation2 + $0x18] sm:$0xff] }
  0x32   :  { %v156_v4 = vld [vmem:[#allocation2 + $0x3f0] sm:$0xff]  ;;  %v153_v5 = vld [vmem:[#allocation2 + $0x3d8] sm:$0xff] }
  0x33   :  { %864 = vmatpush2.bf16.msra.mxu0 %v1156_v12  ;;  %905 = vmatpush2.bf16.msra.mxu1 %v1158_v13  ;;  %v1254_v12 = vcombine.low %v1244_v53, %v1244_v53  ;;  %v81_v13 = vld [vmem:[#allocation2 + $0x198] sm:$0xff]  ;;  %v1088_v53 = vcombine.low %v80_v10, %v84_v11  ;;  %v144_v11 = vld [vmem:[#allocation2 + $0x390] sm:$0xff] }
  0x34   :  { %865 = vmatprep.subr.bf16.mxu0 %v1149_v14  ;;  %906 = vmatprep.subr.bf16.mxu1 %v1151_v15  ;;  %v85_v14 = vld [vmem:[#allocation2 + $0x1b8] sm:$0xff]  ;;  %v1096_v15 = vcombine.low %v88_v2, %v92_v3  ;;  %v152_v3 = vld [vmem:[#allocation2 + $0x3d0] sm:$0xff] }
  0x35   :  { %v1091_v18 = vcombine.high %v81_v13, %v85_v14 }
  0x37   :  { %866 = vmatpush2.bf16.msra.mxu0 %v1148_v20  ;;  %907 = vmatpush2.bf16.msra.mxu1 %v1150_v21  ;;  %v76_v20 = vld [vmem:[#allocation2 + $0x170] sm:$0xff]  ;;  %v73_v21 = vld [vmem:[#allocation2 + $0x158] sm:$0xff] }
  0x38   :  { %867 = vmatprep.subr.bf16.mxu0 %v1141_v22  ;;  %908 = vmatprep.subr.bf16.mxu1 %v1143_v23  ;;  %v77_v22 = vld [vmem:[#allocation2 + $0x178] sm:$0xff]  ;;  %v1090_v23 = vcombine.low %v81_v13, %v85_v14  ;;  %v1081_v24 = vcombine.high %v72_v19, %v76_v20  ;;  %v148_v13 = vld [vmem:[#allocation2 + $0x3b0] sm:$0xff] }
  0x39   :  { %v1083_v25 = vcombine.high %v73_v21, %v77_v22  ;;  %v145_v14 = vld [vmem:[#allocation2 + $0x398] sm:$0xff] }
  0x3b   :  { %868 = vmatpush2.bf16.msra.mxu0 %v1140_v28  ;;  %909 = vmatpush2.bf16.msra.mxu1 %v1142_v29  ;;  %v65_v28 = vld [vmem:[#allocation2 + $0x118] sm:$0xff] }
  0x3c   :  { %869 = vmatprep.subr.bf16.mxu0 %v1133_v30  ;;  %910 = vmatprep.subr.bf16.mxu1 %v1135_v31  ;;  %v69_v29 = vld [vmem:[#allocation2 + $0x138] sm:$0xff]  ;;  %v1080_v30 = vcombine.low %v72_v19, %v76_v20  ;;  %v1082_v31 = vcombine.low %v73_v21, %v77_v22  ;;  %v136_v20 = vld [vmem:[#allocation2 + $0x350] sm:$0xff] }
  0x3d   :  { %v1075_v33 = vcombine.high %v65_v28, %v69_v29  ;;  %v140_v21 = vld [vmem:[#allocation2 + $0x370] sm:$0xff]  ;;  %v137_v22 = vld [vmem:[#allocation2 + $0x358] sm:$0xff] }
  0x3f   :  { %870 = vmatpush2.bf16.msra.mxu0 %v1132_v36  ;;  %911 = vmatpush2.bf16.msra.mxu1 %v1134_v37  ;;  %v57_v36 = vld [vmem:[#allocation2 + $0xd8] sm:$0xff] }
  0x40   :  { %871 = vmatprep.subr.bf16.mxu0 %v1125_v38  ;;  %912 = vmatprep.subr.bf16.mxu1 %v1127_v39  ;;  %v61_v37 = vld [vmem:[#allocation2 + $0xf8] sm:$0xff]  ;;  %v1072_v38 = vcombine.low %v64_v26, %v68_v27  ;;  %v1074_v39 = vcombine.low %v65_v28, %v69_v29  ;;  %v128_v27 = vld [vmem:[#allocation2 + $0x310] sm:$0xff] }
  0x41   :  { %v132_v28 = vld [vmem:[#allocation2 + $0x330] sm:$0xff]  ;;  %v129_v29 = vld [vmem:[#allocation2 + $0x318] sm:$0xff] }
  0x43   :  { %872 = vmatpush2.bf16.msra.mxu0 %v1124_v44  ;;  %913 = vmatpush2.bf16.msra.mxu1 %v1126_v45  ;;  %v53_v44 = vld [vmem:[#allocation2 + $0xb8] sm:$0xff]  ;;  %v1064_v45 = vcombine.low %v56_v34, %v60_v35  ;;  %v120_v35 = vld [vmem:[#allocation2 + $0x2d0] sm:$0xff] }
  0x44   :  { %873 = vmatprep.subr.bf16.mxu0 %v1117_v46  ;;  %914 = vmatprep.subr.bf16.mxu1 %v1119_v47  ;;  %v1066_v46 = vcombine.low %v57_v36, %v61_v37  ;;  %v1057_v47 = vcombine.high %v48_v41, %v52_v42  ;;  %v1059_v48 = vcombine.high %v49_v43, %v53_v44 }
  0x47   :  { %874 = vmatpush2.bf16.msra.mxu0 %v1116_v52  ;;  %915 = vmatpush2.bf16.msra.mxu1 %v1118_v54  ;;  %v45_v52 = vld [vmem:[#allocation2 + $0x78] sm:$0xff]  ;;  %v1056_v54 = vcombine.low %v48_v41, %v52_v42  ;;  %v112_v42 = vld [vmem:[#allocation2 + $0x290] sm:$0xff] }
  0x48   :  { %875 = vmatprep.subr.bf16.mxu0 %v1109_v55  ;;  %916 = vmatprep.subr.bf16.mxu1 %v1111_v56  ;;  %v1058_v55 = vcombine.low %v49_v43, %v53_v44  ;;  %v1049_v56 = vcombine.high %v40_v49, %v44_v50  ;;  %v1051_v58 = vcombine.high %v41_v51, %v45_v52  ;;  %v116_v43 = vld [vmem:[#allocation2 + $0x2b0] sm:$0xff]  ;;  %v113_v44 = vld [vmem:[#allocation2 + $0x298] sm:$0xff] }
  0x4b   :  { %876 = vmatpush2.bf16.msra.mxu0 %v1108_v62  ;;  %917 = vmatpush2.bf16.msra.mxu1 %v1110_v63  ;;  %v37_v62 = vld [vmem:[#allocation2 + $0x38] sm:$0xff]  ;;  %v1048_v63 = vcombine.low %v40_v49, %v44_v50  ;;  %v104_v50 = vld [vmem:[#allocation2 + $0x250] sm:$0xff] }
  0x4c   :  { %877 = vmatprep.subr.bf16.mxu0 %v1101_v0  ;;  %918 = vmatprep.subr.bf16.mxu1 %v1103_v1  ;;  %v1050_v0 = vcombine.low %v41_v51, %v45_v52  ;;  %v1041_v1 = vcombine.high %v32_v59, %v36_v60  ;;  %v1043_v2 = vcombine.high %v33_v61, %v37_v62  ;;  %v108_v51 = vld [vmem:[#allocation2 + $0x270] sm:$0xff]  ;;  %v105_v52 = vld [vmem:[#allocation2 + $0x258] sm:$0xff] }
  0x4f   :  { %878 = vmatpush2.bf16.msra.mxu0 %v1100_v6  ;;  %919 = vmatpush2.bf16.msra.mxu1 %v1102_v7  ;;  %v157_v6 = vld [vmem:[#allocation2 + $0x3f8] sm:$0xff]  ;;  %v1040_v7 = vcombine.low %v32_v59, %v36_v60  ;;  %v96_v60 = vld [vmem:[#allocation2 + $0x210] sm:$0xff] }
  0x50   :  { %929 = vmatprep.subr.bf16.mxu0 %v1097_v8  ;;  %970 = vmatprep.subr.bf16.mxu1 %v1099_v9  ;;  %v1042_v8 = vcombine.low %v33_v61, %v37_v62  ;;  %v1161_v9 = vcombine.high %v152_v3, %v156_v4  ;;  %v1163_v10 = vcombine.high %v153_v5, %v157_v6  ;;  %v100_v61 = vld [vmem:[#allocation2 + $0x230] sm:$0xff]  ;;  %v97_v62 = vld [vmem:[#allocation2 + $0x218] sm:$0xff] }
  0x52   :  { %880 = vmatmul.mubr.bf16.vlgmr.msra.gmra.mxu0 %v1254_v12  ;;  %921 = vmatmul.mubr.bf16.vlgmr.msra.gmra.mxu1 %v1254_v12 }
  0x53   :  { %930 = vmatpush1.bf16.msra.mxu0 %v1096_v15  ;;  %971 = vmatpush1.bf16.msra.mxu1 %v1098_v16  ;;  %v149_v15 = vld [vmem:[#allocation2 + $0x3b8] sm:$0xff]  ;;  %v1160_v16 = vcombine.low %v152_v3, %v156_v4  ;;  %v1104_v4 = vcombine.low %v96_v60, %v100_v61 }
  0x54   :  { %931 = vmatprep.subr.bf16.mxu0 %v1089_v17  ;;  %972 = vmatprep.subr.bf16.mxu1 %v1091_v18  ;;  %v1162_v17 = vcombine.low %v153_v5, %v157_v6  ;;  %v1153_v18 = vcombine.high %v144_v11, %v148_v13  ;;  %v1155_v19 = vcombine.high %v145_v14, %v149_v15  ;;  %v160_v6 = vlaneseq }
  0x55   :  { %961 = vmatprep.mubr.bf16.mxu0 %v1248_v57  ;;  %1002 = vmatprep.mubr.bf16.mxu1 %v1248_v57  ;;  %v1067_v57 = vcombine.high %v57_v36, %v61_v37  ;;  %v124_v36 = vld [vmem:[#allocation2 + $0x2f0] sm:$0xff]  ;;  %v121_v37 = vld [vmem:[#allocation2 + $0x2d8] sm:$0xff] }
  0x57   :  { %932 = vmatpush1.bf16.msra.mxu0 %v1088_v53  ;;  %973 = vmatpush1.bf16.msra.mxu1 %v1090_v23  ;;  %v141_v53 = vld [vmem:[#allocation2 + $0x378] sm:$0xff]  ;;  %v1152_v23 = vcombine.low %v144_v11, %v148_v13 }
  0x58   :  { %933 = vmatprep.subr.bf16.mxu0 %v1081_v24  ;;  %974 = vmatprep.subr.bf16.mxu1 %v1083_v25  ;;  %v1154_v24 = vcombine.low %v145_v14, %v149_v15  ;;  %v1145_v25 = vcombine.high %v136_v20, %v140_v21  ;;  %v1147_v26 = vcombine.high %v137_v22, %v141_v53 }
  0x5b   :  { %934 = vmatpush1.bf16.msra.mxu0 %v1080_v30  ;;  %975 = vmatpush1.bf16.msra.mxu1 %v1082_v31  ;;  %v133_v30 = vld [vmem:[#allocation2 + $0x338] sm:$0xff]  ;;  %v1144_v31 = vcombine.low %v136_v20, %v140_v21 }
  0x5c   :  { %935 = vmatprep.subr.bf16.mxu0 %v1073_v32  ;;  %976 = vmatprep.subr.bf16.mxu1 %v1075_v33  ;;  %v1146_v32 = vcombine.low %v137_v22, %v141_v53  ;;  %v1137_v33 = vcombine.high %v128_v27, %v132_v28  ;;  %v1139_v34 = vcombine.high %v129_v29, %v133_v30 }
  0x5f   :  { %936 = vmatpush1.bf16.msra.mxu0 %v1072_v38  ;;  %977 = vmatpush1.bf16.msra.mxu1 %v1074_v39  ;;  %v125_v38 = vld [vmem:[#allocation2 + $0x2f8] sm:$0xff]  ;;  %v1136_v39 = vcombine.low %v128_v27, %v132_v28 }
  0x60   :  { %937 = vmatprep.subr.bf16.mxu0 %v1065_v40  ;;  %978 = vmatprep.subr.bf16.mxu1 %v1067_v57  ;;  %v1138_v40 = vcombine.low %v129_v29, %v133_v30  ;;  %v1129_v57 = vcombine.high %v120_v35, %v124_v36  ;;  %v1131_v41 = vcombine.high %v121_v37, %v125_v38 }
  0x63   :  { %938 = vmatpush1.bf16.msra.mxu0 %v1064_v45  ;;  %979 = vmatpush1.bf16.msra.mxu1 %v1066_v46  ;;  %v117_v45 = vld [vmem:[#allocation2 + $0x2b8] sm:$0xff]  ;;  %v1128_v46 = vcombine.low %v120_v35, %v124_v36 }
  0x64   :  { %939 = vmatprep.subr.bf16.mxu0 %v1057_v47  ;;  %980 = vmatprep.subr.bf16.mxu1 %v1059_v48  ;;  %v1130_v47 = vcombine.low %v121_v37, %v125_v38  ;;  %v1121_v48 = vcombine.high %v112_v42, %v116_v43  ;;  %v1123_v49 = vcombine.high %v113_v44, %v117_v45 }
  0x67   :  { %940 = vmatpush1.bf16.msra.mxu0 %v1056_v54  ;;  %981 = vmatpush1.bf16.msra.mxu1 %v1058_v55  ;;  %v109_v54 = vld [vmem:[#allocation2 + $0x278] sm:$0xff]  ;;  %v1120_v55 = vcombine.low %v112_v42, %v116_v43 }
  0x68   :  { %941 = vmatprep.subr.bf16.mxu0 %v1049_v56  ;;  %982 = vmatprep.subr.bf16.mxu1 %v1051_v58  ;;  %v1122_v56 = vcombine.low %v113_v44, %v117_v45  ;;  %v1113_v58 = vcombine.high %v104_v50, %v108_v51  ;;  %v1115_v59 = vcombine.high %v105_v52, %v109_v54 }
  0x6b   :  { %942 = vmatpush1.bf16.msra.mxu0 %v1048_v63  ;;  %983 = vmatpush1.bf16.msra.mxu1 %v1050_v0  ;;  %v101_v63 = vld [vmem:[#allocation2 + $0x238] sm:$0xff]  ;;  %v1112_v0 = vcombine.low %v104_v50, %v108_v51 }
  0x6c   :  { %943 = vmatprep.subr.bf16.mxu0 %v1041_v1  ;;  %984 = vmatprep.subr.bf16.mxu1 %v1043_v2  ;;  %v1114_v1 = vcombine.low %v105_v52, %v109_v54  ;;  %v1105_v2 = vcombine.high %v96_v60, %v100_v61  ;;  %v1107_v3 = vcombine.high %v97_v62, %v101_v63 }
  0x6d   :  { %v1106_v5 = vcombine.low %v97_v62, %v101_v63 }
  0x6f   :  { %944 = vmatpush1.bf16.msra.mxu0 %v1040_v7  ;;  %985 = vmatpush1.bf16.msra.mxu1 %v1042_v8  ;;  %v161_v7 = vshrl.u32 %v160_v6, 7 }
  0x70   :  { %945 = vmatprep.subr.bf16.mxu0 %v1161_v9  ;;  %986 = vmatprep.subr.bf16.mxu1 %v1163_v10  ;;  %v158_v9 = vld [vmem:[%s1270_s2] sm:$0xff]  ;;  %s1217_s2 = smov [#allocation5]  }
  0x71   :  { %v162_v8 = vsub.s32 0, %v161_v7  ;;  %v170_v10 = vsub.s32 2, %v161_v7  ;;  %v166_v11 = vsub.s32 1, %v161_v7  ;;  %v174_v13 = vsub.s32 3, %v161_v7  ;;  %s1025_s21 = sshll.u32 %s1217_s2, 4  ;;  %s1026_s21 = int_to_ptr.vmem [resolvable:$true] %s1025_s21 }
  0x72   :  { %v178_v28 = vsub.s32 4, %v161_v7  ;;  %v186_v29 = vsub.s32 6, %v161_v7  ;;  %v182_v30 = vsub.s32 5, %v161_v7  ;;  %s1190_s22 = scalar_lea.vmem %s1026_s21, 1024  ;;  %p1195_p6 = scmp.lt.s32.totalorder %s1026_s21, %s1026_s21 }
  0x73   :  { %946 = vmatpush2.bf16.msra.mxu0 %v1160_v16  ;;  %987 = vmatpush2.bf16.msra.mxu1 %v1162_v17  ;;  %v163_v14 = vrot.slane %v158_v9, %v162_v8  ;;  %v171_v15 = vrot.slane %v158_v9, %v170_v10  ;;  %v167_v16 = vrot.slane %v158_v9, %v166_v11  ;;  %p1191_p5 = scmp.ne.s32.totalorder %s1026_s21, %s1190_s22  ;;  %p1196_p7 = scmp.lt.s32.totalorder %s1190_s22, %s1190_s22 }
  0x74   :  { %947 = vmatprep.subr.bf16.mxu0 %v1153_v18  ;;  %988 = vmatprep.subr.bf16.mxu1 %v1155_v19  ;;  %v175_v18 = vrot.slane %v158_v9, %v174_v13 }
  0x75   :  { %p1197_p8 = por %p1196_p7, %p1195_p6 }
  0x77   :  { %948 = vmatpush2.bf16.msra.mxu0 %v1152_v23  ;;  %989 = vmatpush2.bf16.msra.mxu1 %v1154_v24  ;;  %p1198_p9 = pnand %p1197_p8, %p1191_p5 }
  0x78   :  { %949 = vmatprep.subr.bf16.mxu0 %v1145_v25  ;;  %990 = vmatprep.subr.bf16.mxu1 %v1147_v26 }
  0x7b   :  { %950 = vmatpush2.bf16.msra.mxu0 %v1144_v31  ;;  %991 = vmatpush2.bf16.msra.mxu1 %v1146_v32  ;;  %v190_v31 = vsub.s32 7, %v161_v7  ;;  %v179_v32 = vrot.slane %v158_v9, %v178_v28 }
  0x7c   :  { %951 = vmatprep.subr.bf16.mxu0 %v1137_v33  ;;  %992 = vmatprep.subr.bf16.mxu1 %v1139_v34  ;;  %v187_v33 = vrot.slane %v158_v9, %v186_v29  ;;  %v183_v34 = vrot.slane %v158_v9, %v182_v30 }
  0x7d   :  { %v191_v36 = vrot.slane %v158_v9, %v190_v31 }
  0x7f   :  { %952 = vmatpush2.bf16.msra.mxu0 %v1136_v39  ;;  %993 = vmatpush2.bf16.msra.mxu1 %v1138_v40 }
  0x80   :  { %953 = vmatprep.subr.bf16.mxu0 %v1129_v57  ;;  %994 = vmatprep.subr.bf16.mxu1 %v1131_v41 }
  0x83   :  { %954 = vmatpush2.bf16.msra.mxu0 %v1128_v46  ;;  %995 = vmatpush2.bf16.msra.mxu1 %v1130_v47 }
  0x84   :  { %955 = vmatprep.subr.bf16.mxu0 %v1121_v48  ;;  %996 = vmatprep.subr.bf16.mxu1 %v1123_v49 }
  0x87   :  { %956 = vmatpush2.bf16.msra.mxu0 %v1120_v55  ;;  %997 = vmatpush2.bf16.msra.mxu1 %v1122_v56 }
  0x88   :  { %957 = vmatprep.subr.bf16.mxu0 %v1113_v58  ;;  %998 = vmatprep.subr.bf16.mxu1 %v1115_v59 }
  0x8b   :  { %958 = vmatpush2.bf16.msra.mxu0 %v1112_v0  ;;  %999 = vmatpush2.bf16.msra.mxu1 %v1114_v1 }
  0x8c   :  { %959 = vmatprep.subr.bf16.mxu0 %v1105_v2  ;;  %1000 = vmatprep.subr.bf16.mxu1 %v1107_v3 }
  0x8f   :  { %960 = vmatpush2.bf16.msra.mxu0 %v1104_v4  ;;  %1001 = vmatpush2.bf16.msra.mxu1 %v1106_v5 }
  0x92   :  { %962 = vmatmul.mubr.bf16.vlgmr.msra.gmra.mxu0 %v1254_v12  ;;  %1003 = vmatmul.mubr.bf16.vlgmr.msra.gmra.mxu1 %v1254_v12 }
 0x112   :  { %v881_v17 = vpop.f32.mrf.mxu0  ;;  %v922_v20 = vpop.f32.mrf.mxu1 }
 0x113   :  { %v882_v19 = vadd.f32 %v881_v17, %v163_v14  ;;  %v923_v21 = vadd.f32 %v922_v20, %v171_v15 }
 0x114   :  { %v883_v22 = vpop.f32.mrf.mxu0  ;;  %v924_v53 = vpop.f32.mrf.mxu1 }
 0x115   :  { %1011 = vst [vmem:[#allocation5] sm:$0xff] %v882_v19  ;;  %v884_v12 = vadd.f32 %v883_v22, %v167_v16  ;;  %1013 = vst [vmem:[#allocation5 + $0x10] sm:$0xff] %v923_v21  ;;  %v925_v23 = vadd.f32 %v924_v53, %v175_v18 }
 0x116   :  { %v885_v24 = vpop.f32.mrf.mxu0  ;;  %v926_v25 = vpop.f32.mrf.mxu1 }
 0x117   :  { %1012 = vst [vmem:[#allocation5 + $0x8] sm:$0xff] %v884_v12  ;;  %1014 = vst [vmem:[#allocation5 + $0x18] sm:$0xff] %v925_v23 }
 0x118   :  { %v886_v26 = vpop.f32.mrf.mxu0  ;;  %v927_v27 = vpop.f32.mrf.mxu1 }
 0x152   :  { %v963_v35 = vpop.f32.mrf.mxu0  ;;  %v1004_v38 = vpop.f32.mrf.mxu1 }
 0x153   :  { %v964_v37 = vadd.f32 %v963_v35, %v179_v32  ;;  %v1005_v39 = vadd.f32 %v1004_v38, %v187_v33 }
 0x154   :  { %v965_v40 = vpop.f32.mrf.mxu0  ;;  %v1006_v41 = vpop.f32.mrf.mxu1 }
 0x155   :  { %1015 = vst [vmem:[#allocation5 + $0x20] sm:$0xff] %v964_v37  ;;  %v966_v57 = vadd.f32 %v965_v40, %v183_v34  ;;  %1017 = vst [vmem:[#allocation5 + $0x30] sm:$0xff] %v1005_v39  ;;  %v1007_v42 = vadd.f32 %v1006_v41, %v191_v36 }
 0x156   :  { %v967_v43 = vpop.f32.mrf.mxu0  ;;  %v1008_v44 = vpop.f32.mrf.mxu1 }
 0x157   :  { %1016 = vst [vmem:[#allocation5 + $0x28] sm:$0xff] %v966_v57  ;;  %1018 = vst [vmem:[#allocation5 + $0x38] sm:$0xff] %v1007_v42 }
 0x158   :  { %v968_v45 = vpop.f32.mrf.mxu0  ;;  %v1009_v46 = vpop.f32.mrf.mxu1 }
 0x159   :  { %1201 = shalt.err (!%p1198_p9)
}
 0x15a   :  { %1028 = dma.vmem_to_hbm [thread:$0]  %s1026_s21, 1024, %s1271_s3, [#allocation4]  }
 0x15b   :  { %1212 = dma.done.wait [#allocation4], 1024  }
 0x15c   :  { %1213 = vsyncadd [#allocation4], 4294966272 }
 0x15d   :  { %1032 = vsyncpa [#allocation3], 1 }
 0x15e   :  { %1033 = vsyncpa [#allocation4], 1 }

</bundles_post_ra>
